<compile_context>
chip_gen: v6e
topology: v6e:2x2x1
jax: 0.10.0
libtpu: 0.0.40
codegen_flags: <defaults>
</compile_context>

<pallas_src>
import jax
import jax.numpy as jnp
import numpy as np
from jax.experimental import pallas as pl
from jax.experimental.pallas import tpu as pltpu

# -------- synthetic config (mirrors cfg in NeuralNetwork.__init__) --------
NUM_FEATURES = 32
LAYERWIDTH = 32
NUM_LAYERS = 2          # -> NUM_LAYERS (Linear + Dropout + GELU) blocks, then Linear(W, 1)
B = 8                   # batch
TILE_B = 8              # rows per grid step (multiple of 8)

_SQRT1_2 = 0.7071067811865476


def _gelu_exact(v):
    # Exact GELU 0.5*v*(1+erf(v/sqrt(2))); erf via Abramowitz & Stegun 7.1.26
    # (|err| < 1.5e-7).  VPU ops + one EUP exp only (all Mosaic-supported),
    # matching torch.nn.GELU() (approximate='none') within f32 noise.
    # NOTE: t uses an exact f32 divide; pl.reciprocal(approx=True) would shave a
    # little latency but risks the 1e-4 tolerance, so it is not used.
    z = v * _SQRT1_2
    a = jnp.abs(z)
    t = 1.0 / (1.0 + 0.3275911 * a)
    poly = t * (0.254829592 + t * (-0.284496736 + t * (1.421413741
               + t * (-1.453152027 + t * 1.061405429))))
    erf_abs = 1.0 - poly * jnp.exp(-a * a)
    erf = jnp.where(z >= 0.0, erf_abs, -erf_abs)
    return 0.5 * v * (1.0 + erf)


def mlp_kernel(x_ref, w_ref, b_ref, out_ref):
    x = x_ref[...]                                       # (TILE_B, F)
    h = x
    for i in range(NUM_LAYERS):                          # Linear + Dropout(id) + GELU
        h = _gelu_exact(
            jnp.dot(h, w_ref[i], preferred_element_type=jnp.float32) + b_ref[i])
    # final Linear(W, 1), zero-padded to (W, W): the real logit lives in lane 0
    logits = (jnp.dot(h, w_ref[NUM_LAYERS], preferred_element_type=jnp.float32)
              + b_ref[NUM_LAYERS])                       # (TILE_B, W)
    # squeeze(logits, 1) + x[:, 0], kept sublane-major (no XLU transpose)
    out_ref[...] = logits[:, :1] + x[:, :1]              # (TILE_B, 1)


def pack_params(params, tile_b=TILE_B):
    """Pack [w0,b0,...,wL,bL] into one weight slab and one bias slab.

    Called ONCE at parameter-init time (NOT inside the jitted forward)."""
    assert NUM_FEATURES == LAYERWIDTH, "kernel assumes F == W (pad x otherwise)"
    ws, bs = [], []
    for i in range(len(params) // 2):
        w, b = params[2 * i], params[2 * i + 1]
        fin, fout = w.shape
        ws.append(jnp.pad(w, ((0, LAYERWIDTH - fin), (0, LAYERWIDTH - fout))))
        bp = jnp.pad(b, ((0, LAYERWIDTH - fout),))
        bs.append(jnp.broadcast_to(bp[None, :], (tile_b, LAYERWIDTH)))
    # (L+1, 32, 32) weights, (L+1, TILE_B, 32) pre-broadcast biases
    return jnp.stack(ws), jnp.stack(bs)


@jax.jit
def neural_network_forward(x, w_slab, b_slab):
    batch = x.shape[0]
    out = pl.pallas_call(
        mlp_kernel,
        out_shape=jax.ShapeDtypeStruct((batch, 1), jnp.float32),
        grid=(batch // TILE_B,),
        in_specs=[
            pl.BlockSpec((TILE_B, NUM_FEATURES), lambda i: (i, 0)),
            pl.BlockSpec((NUM_LAYERS + 1, LAYERWIDTH, LAYERWIDTH),
                         lambda i: (0, 0, 0)),
            pl.BlockSpec((NUM_LAYERS + 1, TILE_B, LAYERWIDTH),
                         lambda i: (0, 0, 0)),
        ],
        out_specs=pl.BlockSpec((TILE_B, 1), lambda i: (i, 0)),
        compiler_params=pltpu.CompilerParams(
            dimension_semantics=("parallel",)),   # megacore sharding on v7x
    )(x, w_slab, b_slab)
    return out[:, 0]


def init_params(key):
    """NUM_LAYERS+1 Linear layers, PyTorch-style uniform init, stored as (in, out)."""
    def linear(k, fin, fout):
        k1, k2 = jax.random.split(k)
        bound = 1.0 / float(np.sqrt(fin))
        w = jax.random.uniform(k1, (fin, fout), jnp.float32, -bound, bound)
        b = jax.random.uniform(k2, (fout,), jnp.float32, -bound, bound)
        return w, b

    shapes = ([(NUM_FEATURES, LAYERWIDTH)]
              + [(LAYERWIDTH, LAYERWIDTH)] * (NUM_LAYERS - 1)
              + [(LAYERWIDTH, 1)])
    keys = jax.random.split(key, len(shapes))
    flat = []
    for k, (fi, fo) in zip(keys, shapes):
        w, b = linear(k, fi, fo)
        flat += [w, b]
    return flat


def reference_forward(x, p):
    """Pure-JAX reference matching the PyTorch forward (eval mode, exact GELU)."""
    def gelu(v):
        return 0.5 * v * (1.0 + jax.scipy.special.erf(v * _SQRT1_2))
    h = x
    for i in range(NUM_LAYERS):
        h = gelu(h @ p[2 * i] + p[2 * i + 1])
    logits = h @ p[2 * NUM_LAYERS] + p[2 * NUM_LAYERS + 1]   # (B, 1)
    return logits[:, 0] + x[:, 0]


if __name__ == "__main__":
    key = jax.random.PRNGKey(0)
    kx, kp = jax.random.split(key)
    x = jax.random.normal(kx, (B, NUM_FEATURES), jnp.float32)
    params = init_params(kp)

    # Parameter packing happens once here, outside the per-call jit path.
    w_slab, b_slab = pack_params(params)
    w_slab = jax.block_until_ready(w_slab)
    b_slab = jax.block_until_ready(b_slab)

    out = jax.block_until_ready(neural_network_forward(x, w_slab, b_slab))
    ref = reference_forward(x, params)
    assert np.allclose(np.asarray(out), np.asarray(ref), atol=1e-4, rtol=1e-4), (out, ref)
    print("KERNEL_OK")
</pallas_src>

<mosaic_0001>
module attributes {stable_mosaic.version = 11 : i64} {
  func.func @mlp_kernel(%arg0: i32, %arg1: memref<8x32xf32, #tpu.memory_space<vmem>>, %arg2: memref<3x32x32xf32, #tpu.memory_space<vmem>>, %arg3: memref<3x8x32xf32, #tpu.memory_space<vmem>>, %arg4: memref<8x1xf32, #tpu.memory_space<vmem>>) attributes {dimension_semantics = [#tpu.dimension_semantics<parallel>], iteration_bounds = array<i64: 1>, scalar_prefetch = 0 : i64, scratch_operands = 0 : i64, tpu.core_type = #tpu.core_type<tc>, window_params = [{transform_indices = @transform_0, window_bounds = array<i64: 8, 32>}, {pipeline_mode = #tpu.pipeline_mode<synchronous>, transform_indices = @transform_1, window_bounds = array<i64: 3, 32, 32>}, {pipeline_mode = #tpu.pipeline_mode<synchronous>, transform_indices = @transform_2, window_bounds = array<i64: 3, 8, 32>}, {transform_indices = @transform_3, window_bounds = array<i64: 8, 1>}]} {
    %c0 = arith.constant 0 : index
    %c0_0 = arith.constant 0 : index
    %0 = vector.load %arg1[%c0, %c0_0] : memref<8x32xf32, #tpu.memory_space<vmem>>, vector<8x32xf32>
    %c0_1 = arith.constant 0 : index
    %c0_2 = arith.constant 0 : index
    %c0_3 = arith.constant 0 : index
    %1 = vector.load %arg2[%c0_1, %c0_2, %c0_3] : memref<3x32x32xf32, #tpu.memory_space<vmem>>, vector<1x32x32xf32>
    %2 = vector.shape_cast %1 : vector<1x32x32xf32> to vector<32x32xf32>
    %cst = arith.constant dense<0.000000e+00> : vector<8x32xf32>
    %3 = tpu.matmul %0, %2, %cst {dimension_numbers = #tpu.dot_dimension_numbers<[1], [0], [0], [1], [0, 0, 1, 1], [], []>} : vector<8x32xf32>, vector<32x32xf32>, vector<8x32xf32> -> vector<8x32xf32>
    %c0_4 = arith.constant 0 : index
    %c0_5 = arith.constant 0 : index
    %c0_6 = arith.constant 0 : index
    %4 = vector.load %arg3[%c0_4, %c0_5, %c0_6] : memref<3x8x32xf32, #tpu.memory_space<vmem>>, vector<1x8x32xf32>
    %5 = vector.shape_cast %4 : vector<1x8x32xf32> to vector<8x32xf32>
    %6 = arith.addf %3, %5 : vector<8x32xf32>
    %cst_7 = arith.constant 0.707106769 : f32
    %7 = vector.broadcast %cst_7 : f32 to vector<8x32xf32>
    %8 = arith.mulf %6, %7 : vector<8x32xf32>
    %9 = math.absf %8 : vector<8x32xf32>
    %cst_8 = arith.constant 0.327591091 : f32
    %10 = vector.broadcast %cst_8 : f32 to vector<8x32xf32>
    %11 = arith.mulf %10, %9 : vector<8x32xf32>
    %cst_9 = arith.constant 1.000000e+00 : f32
    %12 = vector.broadcast %cst_9 : f32 to vector<8x32xf32>
    %13 = arith.addf %12, %11 : vector<8x32xf32>
    %cst_10 = arith.constant 1.000000e+00 : f32
    %14 = vector.broadcast %cst_10 : f32 to vector<8x32xf32>
    %15 = arith.divf %14, %13 : vector<8x32xf32>
    %cst_11 = arith.constant 1.06140542 : f32
    %16 = vector.broadcast %cst_11 : f32 to vector<8x32xf32>
    %17 = arith.mulf %15, %16 : vector<8x32xf32>
    %cst_12 = arith.constant -1.45315206 : f32
    %18 = vector.broadcast %cst_12 : f32 to vector<8x32xf32>
    %19 = arith.addf %18, %17 : vector<8x32xf32>
    %20 = arith.mulf %15, %19 : vector<8x32xf32>
    %cst_13 = arith.constant 1.42141378 : f32
    %21 = vector.broadcast %cst_13 : f32 to vector<8x32xf32>
    %22 = arith.addf %21, %20 : vector<8x32xf32>
    %23 = arith.mulf %15, %22 : vector<8x32xf32>
    %cst_14 = arith.constant -0.284496725 : f32
    %24 = vector.broadcast %cst_14 : f32 to vector<8x32xf32>
    %25 = arith.addf %24, %23 : vector<8x32xf32>
    %26 = arith.mulf %15, %25 : vector<8x32xf32>
    %cst_15 = arith.constant 0.254829586 : f32
    %27 = vector.broadcast %cst_15 : f32 to vector<8x32xf32>
    %28 = arith.addf %27, %26 : vector<8x32xf32>
    %29 = arith.mulf %15, %28 : vector<8x32xf32>
    %cst_16 = arith.constant 0.000000e+00 : f32
    %30 = vector.broadcast %cst_16 : f32 to vector<8x32xf32>
    %31 = arith.subf %30, %9 : vector<8x32xf32>
    %32 = arith.mulf %31, %9 : vector<8x32xf32>
    %33 = math.exp %32 : vector<8x32xf32>
    %34 = arith.mulf %29, %33 : vector<8x32xf32>
    %cst_17 = arith.constant 1.000000e+00 : f32
    %35 = vector.broadcast %cst_17 : f32 to vector<8x32xf32>
    %36 = arith.subf %35, %34 : vector<8x32xf32>
    %cst_18 = arith.constant 0.000000e+00 : f32
    %37 = vector.broadcast %cst_18 : f32 to vector<8x32xf32>
    %38 = arith.cmpf oge, %8, %37 : vector<8x32xf32>
    %cst_19 = arith.constant 0.000000e+00 : f32
    %39 = vector.broadcast %cst_19 : f32 to vector<8x32xf32>
    %40 = arith.subf %39, %36 : vector<8x32xf32>
    %41 = arith.select %38, %36, %40 : vector<8x32xi1>, vector<8x32xf32>
    %cst_20 = arith.constant 5.000000e-01 : f32
    %42 = vector.broadcast %cst_20 : f32 to vector<8x32xf32>
    %43 = arith.mulf %42, %6 : vector<8x32xf32>
    %cst_21 = arith.constant 1.000000e+00 : f32
    %44 = vector.broadcast %cst_21 : f32 to vector<8x32xf32>
    %45 = arith.addf %44, %41 : vector<8x32xf32>
    %46 = arith.mulf %43, %45 : vector<8x32xf32>
    %c1 = arith.constant 1 : index
    %c0_22 = arith.constant 0 : index
    %c0_23 = arith.constant 0 : index
    %47 = vector.load %arg2[%c1, %c0_22, %c0_23] : memref<3x32x32xf32, #tpu.memory_space<vmem>>, vector<1x32x32xf32>
    %48 = vector.shape_cast %47 : vector<1x32x32xf32> to vector<32x32xf32>
    %cst_24 = arith.constant dense<0.000000e+00> : vector<8x32xf32>
    %49 = tpu.matmul %46, %48, %cst_24 {dimension_numbers = #tpu.dot_dimension_numbers<[1], [0], [0], [1], [0, 0, 1, 1], [], []>} : vector<8x32xf32>, vector<32x32xf32>, vector<8x32xf32> -> vector<8x32xf32>
    %c1_25 = arith.constant 1 : index
    %c0_26 = arith.constant 0 : index
    %c0_27 = arith.constant 0 : index
    %50 = vector.load %arg3[%c1_25, %c0_26, %c0_27] : memref<3x8x32xf32, #tpu.memory_space<vmem>>, vector<1x8x32xf32>
    %51 = vector.shape_cast %50 : vector<1x8x32xf32> to vector<8x32xf32>
    %52 = arith.addf %49, %51 : vector<8x32xf32>
    %cst_28 = arith.constant 0.707106769 : f32
    %53 = vector.broadcast %cst_28 : f32 to vector<8x32xf32>
    %54 = arith.mulf %52, %53 : vector<8x32xf32>
    %55 = math.absf %54 : vector<8x32xf32>
    %cst_29 = arith.constant 0.327591091 : f32
    %56 = vector.broadcast %cst_29 : f32 to vector<8x32xf32>
    %57 = arith.mulf %56, %55 : vector<8x32xf32>
    %cst_30 = arith.constant 1.000000e+00 : f32
    %58 = vector.broadcast %cst_30 : f32 to vector<8x32xf32>
    %59 = arith.addf %58, %57 : vector<8x32xf32>
    %cst_31 = arith.constant 1.000000e+00 : f32
    %60 = vector.broadcast %cst_31 : f32 to vector<8x32xf32>
    %61 = arith.divf %60, %59 : vector<8x32xf32>
    %cst_32 = arith.constant 1.06140542 : f32
    %62 = vector.broadcast %cst_32 : f32 to vector<8x32xf32>
    %63 = arith.mulf %61, %62 : vector<8x32xf32>
    %cst_33 = arith.constant -1.45315206 : f32
    %64 = vector.broadcast %cst_33 : f32 to vector<8x32xf32>
    %65 = arith.addf %64, %63 : vector<8x32xf32>
    %66 = arith.mulf %61, %65 : vector<8x32xf32>
    %cst_34 = arith.constant 1.42141378 : f32
    %67 = vector.broadcast %cst_34 : f32 to vector<8x32xf32>
    %68 = arith.addf %67, %66 : vector<8x32xf32>
    %69 = arith.mulf %61, %68 : vector<8x32xf32>
    %cst_35 = arith.constant -0.284496725 : f32
    %70 = vector.broadcast %cst_35 : f32 to vector<8x32xf32>
    %71 = arith.addf %70, %69 : vector<8x32xf32>
    %72 = arith.mulf %61, %71 : vector<8x32xf32>
    %cst_36 = arith.constant 0.254829586 : f32
    %73 = vector.broadcast %cst_36 : f32 to vector<8x32xf32>
    %74 = arith.addf %73, %72 : vector<8x32xf32>
    %75 = arith.mulf %61, %74 : vector<8x32xf32>
    %cst_37 = arith.constant 0.000000e+00 : f32
    %76 = vector.broadcast %cst_37 : f32 to vector<8x32xf32>
    %77 = arith.subf %76, %55 : vector<8x32xf32>
    %78 = arith.mulf %77, %55 : vector<8x32xf32>
    %79 = math.exp %78 : vector<8x32xf32>
    %80 = arith.mulf %75, %79 : vector<8x32xf32>
    %cst_38 = arith.constant 1.000000e+00 : f32
    %81 = vector.broadcast %cst_38 : f32 to vector<8x32xf32>
    %82 = arith.subf %81, %80 : vector<8x32xf32>
    %cst_39 = arith.constant 0.000000e+00 : f32
    %83 = vector.broadcast %cst_39 : f32 to vector<8x32xf32>
    %84 = arith.cmpf oge, %54, %83 : vector<8x32xf32>
    %cst_40 = arith.constant 0.000000e+00 : f32
    %85 = vector.broadcast %cst_40 : f32 to vector<8x32xf32>
    %86 = arith.subf %85, %82 : vector<8x32xf32>
    %87 = arith.select %84, %82, %86 : vector<8x32xi1>, vector<8x32xf32>
    %cst_41 = arith.constant 5.000000e-01 : f32
    %88 = vector.broadcast %cst_41 : f32 to vector<8x32xf32>
    %89 = arith.mulf %88, %52 : vector<8x32xf32>
    %cst_42 = arith.constant 1.000000e+00 : f32
    %90 = vector.broadcast %cst_42 : f32 to vector<8x32xf32>
    %91 = arith.addf %90, %87 : vector<8x32xf32>
    %92 = arith.mulf %89, %91 : vector<8x32xf32>
    %c2 = arith.constant 2 : index
    %c0_43 = arith.constant 0 : index
    %c0_44 = arith.constant 0 : index
    %93 = vector.load %arg2[%c2, %c0_43, %c0_44] : memref<3x32x32xf32, #tpu.memory_space<vmem>>, vector<1x32x32xf32>
    %94 = vector.shape_cast %93 : vector<1x32x32xf32> to vector<32x32xf32>
    %cst_45 = arith.constant dense<0.000000e+00> : vector<8x32xf32>
    %95 = tpu.matmul %92, %94, %cst_45 {dimension_numbers = #tpu.dot_dimension_numbers<[1], [0], [0], [1], [0, 0, 1, 1], [], []>} : vector<8x32xf32>, vector<32x32xf32>, vector<8x32xf32> -> vector<8x32xf32>
    %c2_46 = arith.constant 2 : index
    %c0_47 = arith.constant 0 : index
    %c0_48 = arith.constant 0 : index
    %96 = vector.load %arg3[%c2_46, %c0_47, %c0_48] : memref<3x8x32xf32, #tpu.memory_space<vmem>>, vector<1x8x32xf32>
    %97 = vector.shape_cast %96 : vector<1x8x32xf32> to vector<8x32xf32>
    %98 = arith.addf %95, %97 : vector<8x32xf32>
    %99 = vector.extract_strided_slice %98 {offsets = [0, 0], sizes = [8, 1], strides = [1, 1]} : vector<8x32xf32> to vector<8x1xf32>
    %100 = vector.extract_strided_slice %0 {offsets = [0, 0], sizes = [8, 1], strides = [1, 1]} : vector<8x32xf32> to vector<8x1xf32>
    %101 = arith.addf %99, %100 : vector<8x1xf32>
    %c0_49 = arith.constant 0 : index
    %c0_50 = arith.constant 0 : index
    %102 = vector.load %arg4[%c0_49, %c0_50] : memref<8x1xf32, #tpu.memory_space<vmem>>, vector<8x1xf32>
    tpu.vector_store %arg4[%c0_49, %c0_50], %101 {strides = array<i32>} : memref<8x1xf32, #tpu.memory_space<vmem>>, vector<8x1xf32>,
    return
  }
  func.func @transform_0(%arg0: i32) -> (i32, i32) {
    %c0_i32 = arith.constant 0 : i32
    %c0_i32_0 = arith.constant 0 : i32
    return %arg0, %c0_i32 : i32, i32
  }
  func.func @transform_1(%arg0: i32) -> (i32, i32, i32) {
    %c0_i32 = arith.constant 0 : i32
    %c0_i32_0 = arith.constant 0 : i32
    %c0_i32_1 = arith.constant 0 : i32
    %c0_i32_2 = arith.constant 0 : i32
    return %c0_i32, %c0_i32_0, %c0_i32_1 : i32, i32, i32
  }
  func.func @transform_2(%arg0: i32) -> (i32, i32, i32) {
    %c0_i32 = arith.constant 0 : i32
    %c0_i32_0 = arith.constant 0 : i32
    %c0_i32_1 = arith.constant 0 : i32
    %c0_i32_2 = arith.constant 0 : i32
    return %c0_i32, %c0_i32_0, %c0_i32_1 : i32, i32, i32
  }
  func.func @transform_3(%arg0: i32) -> (i32, i32) {
    %c0_i32 = arith.constant 0 : i32
    %c0_i32_0 = arith.constant 0 : i32
    return %arg0, %c0_i32 : i32, i32
  }
}

</mosaic_0001>

<bundles_post_ra>
// kernel: neural_network_forward.1
= control target key start
LH: loop header
LB: loop body
LE: loop exit
PB: predicated region body
PF: predicated region fallthrough
CT: control target
= control target key end

     0   :  { %8 = vsyncpa [#allocation3], 0  ;;  %s550_s0 = inlined_call_operand.hbm [shape: f32[8,32], index: 0, kind: input, shape index: {}]   ;;  %s551_s1 = inlined_call_operand.hbm [shape: f32[3,32,32], index: 1, kind: input, shape index: {}]   ;;  %s552_s2 = inlined_call_operand.hbm [shape: f32[3,8,32], index: 2, kind: input, shape index: {}]   ;;  %s553_s3 = inlined_call_operand.vmem [shape: f32[8,1], index: 3, kind: output, shape index: {}]  }
   0x1   :  { %9 = vsyncpa [#allocation5], 0  ;;  %s486_s12 = smov [#allocation4]  }
   0x2   :  { %s25_s13 = sshll.u32 %s486_s12, 4  ;;  %s26_s13 = int_to_ptr.vmem [resolvable:$true] %s25_s13 }
   0x3   :  { %s430_s14 = scalar_lea.vmem %s26_s13, 1536  ;;  %p435_p1 = scmp.lt.s32.totalorder %s26_s13, %s26_s13 }
   0x4   :  { %p431_p0 = scmp.ne.s32.totalorder %s26_s13, %s430_s14  ;;  %p436_p2 = scmp.lt.s32.totalorder %s430_s14, %s430_s14 }
   0x6   :  { %p437_p3 = por %p436_p2, %p435_p1 }
   0x8   :  { %p438_p4 = pnand %p437_p3, %p431_p0 }
   0xa   :  { %441 = shalt.err (!%p438_p4)
}
   0xb   :  { %s487_s15 = smov 128   ;;  %s488_s16 = smov 8  }
   0xc   :  { %31 = dma.hbm_to_vmem [thread:$0]  %s551_s1, 1536, %s26_s13, [#allocation5], %s487_s15, %s487_s15, %s488_s16  }
   0xd   :  { %s489_s19 = smov [#allocation2]   ;;  %s490_s21 = smov [#allocation6]  }
   0xe   :  { %s16_s20 = sshll.u32 %s489_s19, 4  ;;  %s37_s22 = sshll.u32 %s490_s21, 4  ;;  %s17_s20 = int_to_ptr.vmem [resolvable:$true] %s16_s20  ;;  %s38_s22 = int_to_ptr.vmem [resolvable:$true] %s37_s22 }
   0xf   :  { %s450_s23 = scalar_lea.vmem %s17_s20, 128  ;;  %p455_p6 = scmp.lt.s32.totalorder %s17_s20, %s17_s20 }
  0x10   :  { %p451_p5 = scmp.ne.s32.totalorder %s17_s20, %s450_s23  ;;  %p456_p7 = scmp.lt.s32.totalorder %s450_s23, %s450_s23 }
  0x12   :  { %p457_p8 = por %p456_p7, %p455_p6 }
  0x14   :  { %p458_p9 = pnand %p457_p8, %p451_p5 }
  0x16   :  { %461 = shalt.err (!%p458_p9)
}
  0x17   :  { %19 = dma.hbm_to_vmem [thread:$0]  %s550_s0, 128, %s17_s20, [#allocation3]  }
  0x18   :  { %s470_s26 = scalar_lea.vmem %s38_s22, 384  ;;  %p475_p11 = scmp.lt.s32.totalorder %s38_s22, %s38_s22 }
  0x19   :  { %p471_p10 = scmp.ne.s32.totalorder %s38_s22, %s470_s26  ;;  %p476_p12 = scmp.lt.s32.totalorder %s470_s26, %s470_s26 }
  0x1b   :  { %p477_p13 = por %p476_p12, %p475_p11 }
  0x1d   :  { %p478_p0 = pnand %p477_p13, %p471_p10 }
  0x1f   :  { %481 = shalt.err (!%p478_p0)
}
  0x20   :  { %43 = dma.hbm_to_vmem [thread:$0]  %s552_s2, 384, %s38_s22, [#allocation5], %s487_s15, %s487_s15, %s488_s16  }
  0x21   :  { %482 = dma.done.wait [#allocation3], 128  }
  0x22   :  { %483 = vsyncadd [#allocation3], 4294967168 }
  0x23   :  { %484 = dma.done.wait [#allocation5], 1920  }
  0x24   :  { %485 = vsyncadd [#allocation5], 4294965376  ;;  %v491_v0 = vmov 0.0   ;;  %vm492_vm0 = vmmov 0   ;;  %v57_v1 = vld [vmem:[#allocation4 + $0x18] sm:$0xff]  ;;  %v56_v2 = vld [vmem:[#allocation4 + $0x10] sm:$0xff] }
  0x25   :  { %374 = vmatprep.subr.mxu0 %v491_v0  ;;  %382 = vmatprep.mubr.msk.f32.mxu0 %vm492_vm0, %v491_v0  ;;  %v55_v3 = vld [vmem:[#allocation4 + $0x8] sm:$0xff]  ;;  %v54_v4 = vld [vmem:[#allocation4] sm:$0xff]  ;;  %v530_v5 = vld [vmem:[#allocation2] sm:$0xff]  ;;  %vm59_vm1 = vcmask 261120   ;;  %vm348_vm4 = vcmask 7168  }
  0x26   :  { %385 = vmatprep.subr.mxu1 %v491_v0  ;;  %393 = vmatprep.mubr.msk.f32.mxu1 %vm492_vm0, %v491_v0  ;;  %v164_v6 = vld [vmem:[#allocation4 + $0x38] sm:$0xff]  ;;  %v163_v7 = vld [vmem:[#allocation4 + $0x30] sm:$0xff]  ;;  %v162_v8 = vld [vmem:[#allocation4 + $0x28] sm:$0xff] }
  0x27   :  { %375 = vmatpush3.msra.mxu0 %v57_v1  ;;  %386 = vmatpush3.msra.mxu1 %v164_v6  ;;  %v161_v9 = vld [vmem:[#allocation4 + $0x20] sm:$0xff]  ;;  %v271_v39 = vld [vmem:[#allocation4 + $0x58] sm:$0xff]  ;;  %v270_v40 = vld [vmem:[#allocation4 + $0x50] sm:$0xff] }
  0x28   :  { %376 = vmatprep.subr.mxu0 %v491_v0  ;;  %387 = vmatprep.subr.mxu1 %v491_v0  ;;  %v58_v10 = vld [vmem:[#allocation6] sm:$0xff]  ;;  %v269_v41 = vld [vmem:[#allocation4 + $0x48] sm:$0xff] }
  0x29   :  { %377 = vmatpush3.msra.mxu0 %v56_v2  ;;  %388 = vmatpush3.msra.mxu1 %v163_v7  ;;  %v268_v42 = vld [vmem:[#allocation4 + $0x40] sm:$0xff]  ;;  %v166_v43 = vld [vmem:[#allocation6 + $0x8] sm:$0xff] }
  0x2a   :  { %378 = vmatprep.subr.mxu0 %v491_v0  ;;  %389 = vmatprep.subr.mxu1 %v491_v0 }
  0x2b   :  { %379 = vmatpush3.msra.mxu0 %v55_v3  ;;  %390 = vmatpush3.msra.mxu1 %v162_v8 }
  0x2c   :  { %380 = vmatprep.subr.mxu0 %v491_v0  ;;  %391 = vmatprep.subr.mxu1 %v491_v0 }
  0x2d   :  { %381 = vmatpush3.msra.mxu0 %v54_v4  ;;  %392 = vmatpush3.msra.mxu1 %v161_v9  ;;  %v273_v9 = vld [vmem:[#allocation6 + $0x10] sm:$0xff] }
  0x2e   :  { %383 = vmatmul.mubr.msk.f32.vlgmr.msra.gmra.mxu0 %vm59_vm1, %v530_v5  ;;  %396 = vmatprep.subr.mxu0 %v491_v0 }
  0x2f   :  { %404 = vmatprep.mubr.msk.f32.mxu0 %vm492_vm0, %v491_v0  ;;  %397 = vmatpush3.msra.mxu0 %v271_v39 }
  0x30   :  { %398 = vmatprep.subr.mxu0 %v491_v0 }
  0x31   :  { %399 = vmatpush3.msra.mxu0 %v270_v40 }
  0x32   :  { %400 = vmatprep.subr.mxu0 %v491_v0 }
  0x33   :  { %401 = vmatpush3.msra.mxu0 %v269_v41 }
  0x34   :  { %402 = vmatprep.subr.mxu0 %v491_v0 }
  0x35   :  { %403 = vmatpush3.msra.mxu0 %v268_v42 }
  0xee   :  { %v129_v11 = vpop.f32.mrf.mxu0 }
  0xef   :  { %v130_v12 = vadd.f32 %v129_v11, %v58_v10 }
  0xf0   :  { %v384_v13 = vpop.f32.mrf.mxu0 }
  0xf1   :  { %v133_v14 = vmul.f32 0.70710677, %v130_v12  ;;  %v157_v36 = vmul.f32 0.5, %v130_v12 }
  0xf3   :  { %v134_v15 = vand.u32 2147483647, %v133_v14  ;;  %vm154_vm2 = vcmp.ge.f32.partialorder %v133_v14, 0.0 }
  0xf5   :  { %v135_v16 = vmul.f32 0.3275911, %v134_v15  ;;  %v148_v18 = vsub.f32 0.0, %v134_v15 }
  0xf7   :  { %v136_v17 = vadd.f32 1.0, %v135_v16  ;;  %v149_v19 = vmul.f32 %v148_v18, %v134_v15 }
  0xf9   :  { %414 = vrcp.f32 %v136_v17  ;;  %v150_v22 = vmul.f32 1.442695, %v149_v19 }
  0xfb   :  { %416 = vpow2.f32 %v150_v22 }
 0x106   :  { %v415_v20 = vpop.eup %414 }
 0x107   :  { %v139_v21 = vmul.f32 1.0614054, %v415_v20 }
 0x108   :  { %v417_v31 = vpop.eup %416 }
 0x109   :  { %v140_v23 = vadd.f32 -1.4531521, %v139_v21 }
 0x10b   :  { %v141_v24 = vmul.f32 %v415_v20, %v140_v23 }
 0x10d   :  { %v142_v25 = vadd.f32 1.4214138, %v141_v24 }
 0x10f   :  { %v143_v26 = vmul.f32 %v415_v20, %v142_v25 }
 0x111   :  { %v144_v27 = vadd.f32 -0.28449672, %v143_v26 }
 0x113   :  { %v145_v28 = vmul.f32 %v415_v20, %v144_v27 }
 0x115   :  { %v146_v29 = vadd.f32 0.2548296, %v145_v28 }
 0x117   :  { %v147_v30 = vmul.f32 %v415_v20, %v146_v29 }
 0x119   :  { %v152_v32 = vmul.f32 %v417_v31, %v147_v30 }
 0x11b   :  { %v153_v33 = vsub.f32 1.0, %v152_v32 }
 0x11d   :  { %v155_v34 = vsub.f32 0.0, %v153_v33 }
 0x11f   :  { %v156_v35 = vsel %vm154_vm2, %v153_v33, %v155_v34 }
 0x120   :  { %v158_v37 = vadd.f32 1.0, %v156_v35 }
 0x122   :  { %v159_v38 = vmul.f32 %v158_v37, %v157_v36 }
 0x124   :  { %394 = vmatmul.mubr.msk.f32.vlgmr.msra.gmra.mxu1 %vm59_vm1, %v159_v38 }
 0x1e4   :  { %v236_v44 = vpop.f32.mrf.mxu1 }
 0x1e5   :  { %v237_v45 = vadd.f32 %v236_v44, %v166_v43 }
 0x1e6   :  { %v395_v46 = vpop.f32.mrf.mxu1 }
 0x1e7   :  { %v240_v47 = vmul.f32 0.70710677, %v237_v45  ;;  %v264_v6 = vmul.f32 0.5, %v237_v45 }
 0x1e9   :  { %v241_v48 = vand.u32 2147483647, %v240_v47  ;;  %vm261_vm3 = vcmp.ge.f32.partialorder %v240_v47, 0.0 }
 0x1eb   :  { %v242_v49 = vmul.f32 0.3275911, %v241_v48  ;;  %v255_v51 = vsub.f32 0.0, %v241_v48 }
 0x1ed   :  { %v243_v50 = vadd.f32 1.0, %v242_v49  ;;  %v256_v52 = vmul.f32 %v255_v51, %v241_v48 }
 0x1ef   :  { %418 = vrcp.f32 %v243_v50  ;;  %v257_v55 = vmul.f32 1.442695, %v256_v52 }
 0x1f1   :  { %420 = vpow2.f32 %v257_v55 }
 0x1fc   :  { %v419_v53 = vpop.eup %418 }
 0x1fd   :  { %v246_v54 = vmul.f32 1.0614054, %v419_v53 }
 0x1fe   :  { %v421_v0 = vpop.eup %420 }
 0x1ff   :  { %v247_v56 = vadd.f32 -1.4531521, %v246_v54 }
 0x201   :  { %v248_v57 = vmul.f32 %v419_v53, %v247_v56 }
 0x203   :  { %v249_v58 = vadd.f32 1.4214138, %v248_v57 }
 0x205   :  { %v250_v59 = vmul.f32 %v419_v53, %v249_v58 }
 0x207   :  { %v251_v60 = vadd.f32 -0.28449672, %v250_v59 }
 0x209   :  { %v252_v61 = vmul.f32 %v419_v53, %v251_v60 }
 0x20b   :  { %v253_v62 = vadd.f32 0.2548296, %v252_v61 }
 0x20d   :  { %v254_v63 = vmul.f32 %v419_v53, %v253_v62 }
 0x20f   :  { %v259_v1 = vmul.f32 %v421_v0, %v254_v63 }
 0x211   :  { %v260_v2 = vsub.f32 1.0, %v259_v1 }
 0x213   :  { %v262_v3 = vsub.f32 0.0, %v260_v2 }
 0x215   :  { %v263_v4 = vsel %vm261_vm3, %v260_v2, %v262_v3 }
 0x216   :  { %v265_v7 = vadd.f32 1.0, %v263_v4 }
 0x218   :  { %v266_v8 = vmul.f32 %v265_v7, %v264_v6 }
 0x21a   :  { %405 = vmatmul.mubr.msk.f32.vlgmr.msra.gmra.mxu0 %vm59_vm1, %v266_v8 }
 0x2da   :  { %v343_v10 = vpop.f32.mrf.mxu0 }
 0x2db   :  { %v344_v11 = vadd.f32 %v343_v10, %v273_v9 }
 0x2dc   :  { %v406_v12 = vpop.f32.mrf.mxu0 }
 0x2dd   :  { %v347_v13 = vadd.f32 %v344_v11, %v530_v5 }
 0x2df   :  { %349 = vst.msk [vmem:[%s553_s3] sm:$0xff] %vm348_vm4, %v347_v13 }
 0x2e0   :  { %354 = vsyncpa [#allocation3], 1 }
 0x2e1   :  { %355 = vsyncpa [#allocation5], 1 }

</bundles_post_ra>
